<compile_context>
chip_gen: v5e
topology: v5e:2x2
jax: 0.10.0
libtpu: 0.0.40
codegen_flags: <defaults>
</compile_context>

<pallas_src>
import jax
import jax.numpy as jnp
from jax import lax
from jax.experimental import pallas as pl
from jax.experimental.pallas import tpu as pltpu


# ----------------------------------------------------------------------------
# Stage 1: per-token projections (sp, tp), grid = (B, L/TP).  O(B*L) work.
#   sp = relu(x@Ws^T+bs) @ W2s^T
#   tp = relu(x@Wt^T+bt) @ W2t^T + b2
# ----------------------------------------------------------------------------
def _proj_kernel(x_ref, ws_ref, bs_ref, wt_ref, bt_ref,
                 w2s_ref, w2t_ref, b2_ref, sp_ref, tp_ref):
    cdt = ws_ref.dtype
    x = x_ref[...]                                                   # (TP, H)

    s = jnp.maximum(
        jnp.dot(x, ws_ref[...], preferred_element_type=jnp.float32) + bs_ref[...],
        0.0)                                                         # (TP, Hd) f32
    t = jnp.maximum(
        jnp.dot(x, wt_ref[...], preferred_element_type=jnp.float32) + bt_ref[...],
        0.0)                                                         # (TP, Hd) f32

    sp = jnp.dot(s.astype(cdt), w2s_ref[...],
                 preferred_element_type=jnp.float32)                 # (TP, Hd)
    tp = jnp.dot(t.astype(cdt), w2t_ref[...],
                 preferred_element_type=jnp.float32) + b2_ref[...]   # (TP, Hd)

    sp_ref[...] = sp.astype(sp_ref.dtype)
    tp_ref[...] = tp.astype(tp_ref.dtype)


# ----------------------------------------------------------------------------
# Stage 2: pairwise tile, grid = (B, L/TI, L/TJ).  O(B*L^2) hot path.
#   sp_ref : (TI, Hd, 1)   -- per-i column vectors (Hd on sublanes)
#   tpt_ref: (Hd, TJ)      -- tp transposed, TJ on lanes
#   w3_ref : (N, Hd)
#   o_ref  : (TI, N, TJ)   -- permute(0,1,3,2) fused, lane-dense along TJ
# ----------------------------------------------------------------------------
def _pairwise_kernel(sp_ref, tpt_ref, w3_ref, o_ref):
    ti = o_ref.shape[0]
    # Loop-invariant loads (small; compiler may keep in vregs or reload cheaply).
    tpt = tpt_ref[...]                                   # (Hd, TJ)
    w3 = w3_ref[...]                                     # (N, Hd)
    unroll = next((u for u in (8, 4, 2) if ti % u == 0), 1)

    def body(i, carry):
        sp_col = sp_ref[i]                               # (Hd, 1)
        # Hot path: 1 add + 1 max per element, lane-dense along TJ even for
        # Hd < 128; broadcast of the (Hd, 1) column along lanes is the cheap
        # replicated-layout path.
        h = jnp.maximum(sp_col + tpt, 0.0)               # (Hd, TJ)
        # Canonical matmul: contraction dim Hd is first in h, so no transpose /
        # per-row relayout of the big operand; num_labels only underfills the
        # MXU sublane (M) side.
        out_i = jnp.dot(w3, h.astype(w3.dtype),
                        preferred_element_type=jnp.float32)   # (N, TJ)
        o_ref[i] = out_i.astype(o_ref.dtype)             # lane-dense store
        return carry

    lax.fori_loop(0, ti, body, 0, unroll=unroll)


# ----------------------------------------------------------------------------
# Wrapper
# ----------------------------------------------------------------------------
def _round_up(x, m):
    return ((x + m - 1) // m) * m


def _largest_divisor_tile(dim, target, align):
    """Largest multiple of `align` that divides `dim` and is <= target, else None."""
    t = (min(target, dim) // align) * align
    while t >= align:
        if dim % t == 0:
            return t
        t -= align
    return None


def _plan_tiles(L, ti_target, tj_target):
    """Returns (Lp, TI, TJ): padded length and stage-2 tiles (TI|Lp, TJ|Lp)."""
    if L <= ti_target and L <= tj_target:
        return L, L, L                      # full-dim blocks: always legal
    ti = _largest_divisor_tile(L, ti_target, 8)
    tj = _largest_divisor_tile(L, tj_target, 128)
    if ti is not None and tj is not None:
        return L, ti, tj
    # Pad L so lane-dense, 128-multiple TJ tiles exist (unmasked output stores).
    Lp = _round_up(L, 128)
    ti = _largest_divisor_tile(Lp, ti_target, 8)
    tj = _largest_divisor_tile(Lp, tj_target, 128)
    return Lp, ti, tj


def _default_compute_dtype():
    """bf16 on v6e/v7x (bf16 VPU); f32 on v5e (no bf16 VALU -> bf16 costs more)."""
    try:
        kind = jax.devices()[0].device_kind.lower()
    except Exception:
        return jnp.bfloat16
    if "v5 lite" in kind or "v5e" in kind or "v5lite" in kind:
        return jnp.float32
    return jnp.bfloat16


def linear_layer_forward(x, params, *, compute_dtype=None, out_dtype=None,
                         ti_target=256, tj_target=512):
    B, L, H = x.shape
    Hd = params["ws"].shape[0]
    N = params["w3"].shape[0]
    cdt = compute_dtype if compute_dtype is not None else _default_compute_dtype()
    odt = out_dtype if out_dtype is not None else x.dtype

    Lp, TI, TJ = _plan_tiles(L, ti_target, tj_target)
    TP = Lp if Lp <= 256 else _largest_divisor_tile(Lp, 256, 8)

    # Host-side glue: pre-transpose weights so every in-kernel matmul is
    # row-major; split fc2 weight into the s-half and t-half of the concat.
    ws_t = params["ws"].T.astype(cdt)              # (H, Hd)
    wt_t = params["wt"].T.astype(cdt)              # (H, Hd)
    w2s_t = params["w2"][:, :Hd].T.astype(cdt)     # (Hd, Hd)  acts on s
    w2t_t = params["w2"][:, Hd:].T.astype(cdt)     # (Hd, Hd)  acts on t
    w3 = params["w3"].astype(cdt)                  # (N, Hd)
    bs = params["bs"].reshape(1, Hd).astype(jnp.float32)
    bt = params["bt"].reshape(1, Hd).astype(jnp.float32)
    b2 = params["b2"].reshape(1, Hd).astype(jnp.float32)

    x_c = x.astype(cdt)
    if Lp != L:
        x_c = jnp.pad(x_c, ((0, 0), (0, Lp - L), (0, 0)))

    def _w2d(shape):
        return pl.BlockSpec(shape, lambda b, p: (0, 0))

    # ---------------- Stage 1: sp/tp = (B, Lp, Hd) in compute dtype ----------
    sp, tp = pl.pallas_call(
        _proj_kernel,
        out_shape=(jax.ShapeDtypeStruct((B, Lp, Hd), cdt),
                   jax.ShapeDtypeStruct((B, Lp, Hd), cdt)),
        grid_spec=pltpu.PrefetchScalarGridSpec(
            num_scalar_prefetch=0,
            grid=(B, Lp // TP),
            in_specs=[
                pl.BlockSpec((None, TP, H), lambda b, p: (b, p, 0)),   # x
                _w2d((H, Hd)), _w2d((1, Hd)),                          # s_fc
                _w2d((H, Hd)), _w2d((1, Hd)),                          # t_fc
                _w2d((Hd, Hd)), _w2d((Hd, Hd)), _w2d((1, Hd)),         # fc2 split
            ],
            out_specs=[
                pl.BlockSpec((None, TP, Hd), lambda b, p: (b, p, 0)),
                pl.BlockSpec((None, TP, Hd), lambda b, p: (b, p, 0)),
            ],
        ),
        compiler_params=pltpu.CompilerParams(
            dimension_semantics=("parallel", "parallel")),
    )(x_c, ws_t, bs, wt_t, bt, w2s_t, w2t_t, b2)

    # Cheap XLA layout glue (O(B*L*Hd), off the L^2 hot path):
    #   tp transposed so stage 2 gets (Hd, TJ) blocks directly (lane-dense h),
    #   sp reshaped to column vectors so sp_ref[i] is already (Hd, 1).
    tpt = jnp.transpose(tp, (0, 2, 1))             # (B, Hd, Lp)
    sp_col = sp.reshape(B, Lp, Hd, 1)              # (B, Lp, Hd, 1) -- view

    # ---------------- Stage 2: pairwise tiles, permute fused -----------------
    out = pl.pallas_call(
        _pairwise_kernel,
        out_shape=jax.ShapeDtypeStruct((B, Lp, N, Lp), odt),
        grid_spec=pltpu.PrefetchScalarGridSpec(
            num_scalar_prefetch=0,
            grid=(B, Lp // TI, Lp // TJ),
            in_specs=[
                pl.BlockSpec((None, TI, Hd, 1), lambda b, i, j: (b, i, 0, 0)),  # sp cols
                pl.BlockSpec((None, Hd, TJ), lambda b, i, j: (b, 0, j)),        # tp^T
                pl.BlockSpec((N, Hd), lambda b, i, j: (0, 0)),                  # w3
            ],
            out_specs=pl.BlockSpec((None, TI, N, TJ),
                                   lambda b, i, j: (b, i, 0, j)),
        ),
        compiler_params=pltpu.CompilerParams(
            # all independent axes; keep B (or Lp/TI) even so both v7x TCs work
            dimension_semantics=("parallel", "parallel", "parallel"),
            vmem_limit_bytes=32 * 1024 * 1024),
    )(sp_col, tpt, w3)

    if Lp != L:
        out = out[:, :L, :, :L]
    # already (B, L, num_labels, L): the PyTorch permute(0,1,3,2) is fused.
    return out


# ----------------------------------------------------------------------------
# Pure-JAX reference (mirrors the PyTorch forward exactly)
# ----------------------------------------------------------------------------
def reference_forward(x, params):
    s = jax.nn.relu(jnp.einsum("blh,oh->blo", x, params["ws"]) + params["bs"])
    t = jax.nn.relu(jnp.einsum("blh,oh->blo", x, params["wt"]) + params["bt"])
    B, L, Hd = s.shape
    s_e = jnp.broadcast_to(s[:, :, None, :], (B, L, L, Hd))
    t_e = jnp.broadcast_to(t[:, None, :, :], (B, L, L, Hd))
    cat = jnp.concatenate([s_e, t_e], axis=-1)
    h = jax.nn.relu(jnp.einsum("bijk,ok->bijo", cat, params["w2"]) + params["b2"])
    out = jnp.einsum("bijh,nh->bijn", h, params["w3"])
    return jnp.transpose(out, (0, 1, 3, 2))


if __name__ == "__main__":
    B, L, H, Hd, N = 2, 8, 32, 32, 4

    key = jax.random.PRNGKey(0)
    keys = jax.random.split(key, 8)
    params = {
        "ws": jax.random.normal(keys[0], (Hd, H), jnp.float32) * 0.1,
        "bs": jax.random.normal(keys[1], (Hd,), jnp.float32) * 0.1,
        "wt": jax.random.normal(keys[2], (Hd, H), jnp.float32) * 0.1,
        "bt": jax.random.normal(keys[3], (Hd,), jnp.float32) * 0.1,
        "w2": jax.random.normal(keys[4], (Hd, 2 * Hd), jnp.float32) * 0.1,
        "b2": jax.random.normal(keys[5], (Hd,), jnp.float32) * 0.1,
        # fc3.weight.data.normal_() in init_weights -> std 1.0, no bias
        "w3": jax.random.normal(keys[6], (N, Hd), jnp.float32),
    }
    x = jax.random.normal(keys[7], (B, L, H), jnp.float32)

    ref = reference_forward(x, params)

    # 1) f32 path: tight semantic check.
    out_f32 = jax.block_until_ready(
        linear_layer_forward(x, params, compute_dtype=jnp.float32))
    assert out_f32.shape == (B, L, N, L), out_f32.shape
    assert jnp.allclose(out_f32, ref, rtol=2e-2, atol=2e-2), \
        float(jnp.max(jnp.abs(out_f32 - ref)))

    # 2) default path (bf16 on v6e/v7x, f32 on v5e), looser tolerance.
    out_def = jax.block_until_ready(linear_layer_forward(x, params))
    assert out_def.shape == (B, L, N, L), out_def.shape
    assert jnp.allclose(out_def, ref, rtol=5e-2, atol=5e-2), \
        float(jnp.max(jnp.abs(out_def - ref)))

    print("KERNEL_OK")
</pallas_src>

<mosaic_0001>
module attributes {stable_mosaic.version = 11 : i64} {
  func.func @_proj_kernel(%arg0: i32, %arg1: i32, %arg2: memref<1x8x32xf32, #tpu.memory_space<vmem>>, %arg3: memref<32x32xf32, #tpu.memory_space<vmem>>, %arg4: memref<1x32xf32, #tpu.memory_space<vmem>>, %arg5: memref<32x32xf32, #tpu.memory_space<vmem>>, %arg6: memref<1x32xf32, #tpu.memory_space<vmem>>, %arg7: memref<32x32xf32, #tpu.memory_space<vmem>>, %arg8: memref<32x32xf32, #tpu.memory_space<vmem>>, %arg9: memref<1x32xf32, #tpu.memory_space<vmem>>, %arg10: memref<1x8x32xf32, #tpu.memory_space<vmem>>, %arg11: memref<1x8x32xf32, #tpu.memory_space<vmem>>) attributes {dimension_semantics = [#tpu.dimension_semantics<parallel>, #tpu.dimension_semantics<parallel>], iteration_bounds = array<i64: 2, 1>, scalar_prefetch = 0 : i64, scratch_operands = 0 : i64, tpu.core_type = #tpu.core_type<tc>, window_params = [{transform_indices = @transform_0, window_bounds = array<i64: 1, 8, 32>}, {pipeline_mode = #tpu.pipeline_mode<synchronous>, transform_indices = @transform_1, window_bounds = array<i64: 32, 32>}, {pipeline_mode = #tpu.pipeline_mode<synchronous>, transform_indices = @transform_2, window_bounds = array<i64: 1, 32>}, {pipeline_mode = #tpu.pipeline_mode<synchronous>, transform_indices = @transform_3, window_bounds = array<i64: 32, 32>}, {pipeline_mode = #tpu.pipeline_mode<synchronous>, transform_indices = @transform_4, window_bounds = array<i64: 1, 32>}, {pipeline_mode = #tpu.pipeline_mode<synchronous>, transform_indices = @transform_5, window_bounds = array<i64: 32, 32>}, {pipeline_mode = #tpu.pipeline_mode<synchronous>, transform_indices = @transform_6, window_bounds = array<i64: 32, 32>}, {pipeline_mode = #tpu.pipeline_mode<synchronous>, transform_indices = @transform_7, window_bounds = array<i64: 1, 32>}, {transform_indices = @transform_8, window_bounds = array<i64: 1, 8, 32>}, {transform_indices = @transform_9, window_bounds = array<i64: 1, 8, 32>}]} {
    %c0 = arith.constant 0 : index
    %c0_0 = arith.constant 0 : index
    %c0_1 = arith.constant 0 : index
    %0 = vector.load %arg2[%c0, %c0_0, %c0_1] : memref<1x8x32xf32, #tpu.memory_space<vmem>>, vector<1x8x32xf32>
    %1 = vector.shape_cast %0 : vector<1x8x32xf32> to vector<8x32xf32>
    %c0_2 = arith.constant 0 : index
    %c0_3 = arith.constant 0 : index
    %2 = vector.load %arg3[%c0_2, %c0_3] : memref<32x32xf32, #tpu.memory_space<vmem>>, vector<32x32xf32>
    %cst = arith.constant dense<0.000000e+00> : vector<8x32xf32>
    %3 = tpu.matmul %1, %2, %cst {dimension_numbers = #tpu.dot_dimension_numbers<[1], [0], [0], [1], [0, 0, 1, 1], [], []>} : vector<8x32xf32>, vector<32x32xf32>, vector<8x32xf32> -> vector<8x32xf32>
    %c0_4 = arith.constant 0 : index
    %c0_5 = arith.constant 0 : index
    %4 = vector.load %arg4[%c0_4, %c0_5] : memref<1x32xf32, #tpu.memory_space<vmem>>, vector<1x32xf32>
    %5 = vector.broadcast %4 : vector<1x32xf32> to vector<8x32xf32>
    %6 = arith.addf %3, %5 : vector<8x32xf32>
    %cst_6 = arith.constant 0.000000e+00 : f32
    %7 = vector.broadcast %cst_6 : f32 to vector<8x32xf32>
    %8 = arith.maximumf %6, %7 : vector<8x32xf32>
    %c0_7 = arith.constant 0 : index
    %c0_8 = arith.constant 0 : index
    %9 = vector.load %arg5[%c0_7, %c0_8] : memref<32x32xf32, #tpu.memory_space<vmem>>, vector<32x32xf32>
    %cst_9 = arith.constant dense<0.000000e+00> : vector<8x32xf32>
    %10 = tpu.matmul %1, %9, %cst_9 {dimension_numbers = #tpu.dot_dimension_numbers<[1], [0], [0], [1], [0, 0, 1, 1], [], []>} : vector<8x32xf32>, vector<32x32xf32>, vector<8x32xf32> -> vector<8x32xf32>
    %c0_10 = arith.constant 0 : index
    %c0_11 = arith.constant 0 : index
    %11 = vector.load %arg6[%c0_10, %c0_11] : memref<1x32xf32, #tpu.memory_space<vmem>>, vector<1x32xf32>
    %12 = vector.broadcast %11 : vector<1x32xf32> to vector<8x32xf32>
    %13 = arith.addf %10, %12 : vector<8x32xf32>
    %cst_12 = arith.constant 0.000000e+00 : f32
    %14 = vector.broadcast %cst_12 : f32 to vector<8x32xf32>
    %15 = arith.maximumf %13, %14 : vector<8x32xf32>
    %c0_13 = arith.constant 0 : index
    %c0_14 = arith.constant 0 : index
    %16 = vector.load %arg7[%c0_13, %c0_14] : memref<32x32xf32, #tpu.memory_space<vmem>>, vector<32x32xf32>
    %cst_15 = arith.constant dense<0.000000e+00> : vector<8x32xf32>
    %17 = tpu.matmul %8, %16, %cst_15 {dimension_numbers = #tpu.dot_dimension_numbers<[1], [0], [0], [1], [0, 0, 1, 1], [], []>} : vector<8x32xf32>, vector<32x32xf32>, vector<8x32xf32> -> vector<8x32xf32>
    %c0_16 = arith.constant 0 : index
    %c0_17 = arith.constant 0 : index
    %18 = vector.load %arg8[%c0_16, %c0_17] : memref<32x32xf32, #tpu.memory_space<vmem>>, vector<32x32xf32>
    %cst_18 = arith.constant dense<0.000000e+00> : vector<8x32xf32>
    %19 = tpu.matmul %15, %18, %cst_18 {dimension_numbers = #tpu.dot_dimension_numbers<[1], [0], [0], [1], [0, 0, 1, 1], [], []>} : vector<8x32xf32>, vector<32x32xf32>, vector<8x32xf32> -> vector<8x32xf32>
    %c0_19 = arith.constant 0 : index
    %c0_20 = arith.constant 0 : index
    %20 = vector.load %arg9[%c0_19, %c0_20] : memref<1x32xf32, #tpu.memory_space<vmem>>, vector<1x32xf32>
    %21 = vector.broadcast %20 : vector<1x32xf32> to vector<8x32xf32>
    %22 = arith.addf %19, %21 : vector<8x32xf32>
    %c0_21 = arith.constant 0 : index
    %c0_22 = arith.constant 0 : index
    %c0_23 = arith.constant 0 : index
    %23 = vector.load %arg10[%c0_21, %c0_22, %c0_23] : memref<1x8x32xf32, #tpu.memory_space<vmem>>, vector<1x8x32xf32>
    %24 = vector.shape_cast %23 : vector<1x8x32xf32> to vector<8x32xf32>
    %25 = vector.shape_cast %17 : vector<8x32xf32> to vector<1x8x32xf32>
    tpu.vector_store %arg10[%c0_21, %c0_22, %c0_23], %25 {strides = array<i32>} : memref<1x8x32xf32, #tpu.memory_space<vmem>>, vector<1x8x32xf32>,
    %c0_24 = arith.constant 0 : index
    %c0_25 = arith.constant 0 : index
    %c0_26 = arith.constant 0 : index
    %26 = vector.load %arg11[%c0_24, %c0_25, %c0_26] : memref<1x8x32xf32, #tpu.memory_space<vmem>>, vector<1x8x32xf32>
    %27 = vector.shape_cast %26 : vector<1x8x32xf32> to vector<8x32xf32>
    %28 = vector.shape_cast %22 : vector<8x32xf32> to vector<1x8x32xf32>
    tpu.vector_store %arg11[%c0_24, %c0_25, %c0_26], %28 {strides = array<i32>} : memref<1x8x32xf32, #tpu.memory_space<vmem>>, vector<1x8x32xf32>,
    return
  }
  func.func @transform_0(%arg0: i32, %arg1: i32) -> (i32, i32, i32) {
    %c0_i32 = arith.constant 0 : i32
    %c0_i32_0 = arith.constant 0 : i32
    return %arg0, %arg1, %c0_i32 : i32, i32, i32
  }
  func.func @transform_1(%arg0: i32, %arg1: i32) -> (i32, i32) {
    %c0_i32 = arith.constant 0 : i32
    %c0_i32_0 = arith.constant 0 : i32
    %c0_i32_1 = arith.constant 0 : i32
    return %c0_i32, %c0_i32_0 : i32, i32
  }
  func.func @transform_2(%arg0: i32, %arg1: i32) -> (i32, i32) {
    %c0_i32 = arith.constant 0 : i32
    %c0_i32_0 = arith.constant 0 : i32
    %c0_i32_1 = arith.constant 0 : i32
    return %c0_i32, %c0_i32_0 : i32, i32
  }
  func.func @transform_3(%arg0: i32, %arg1: i32) -> (i32, i32) {
    %c0_i32 = arith.constant 0 : i32
    %c0_i32_0 = arith.constant 0 : i32
    %c0_i32_1 = arith.constant 0 : i32
    return %c0_i32, %c0_i32_0 : i32, i32
  }
  func.func @transform_4(%arg0: i32, %arg1: i32) -> (i32, i32) {
    %c0_i32 = arith.constant 0 : i32
    %c0_i32_0 = arith.constant 0 : i32
    %c0_i32_1 = arith.constant 0 : i32
    return %c0_i32, %c0_i32_0 : i32, i32
  }
  func.func @transform_5(%arg0: i32, %arg1: i32) -> (i32, i32) {
    %c0_i32 = arith.constant 0 : i32
    %c0_i32_0 = arith.constant 0 : i32
    %c0_i32_1 = arith.constant 0 : i32
    return %c0_i32, %c0_i32_0 : i32, i32
  }
  func.func @transform_6(%arg0: i32, %arg1: i32) -> (i32, i32) {
    %c0_i32 = arith.constant 0 : i32
    %c0_i32_0 = arith.constant 0 : i32
    %c0_i32_1 = arith.constant 0 : i32
    return %c0_i32, %c0_i32_0 : i32, i32
  }
  func.func @transform_7(%arg0: i32, %arg1: i32) -> (i32, i32) {
    %c0_i32 = arith.constant 0 : i32
    %c0_i32_0 = arith.constant 0 : i32
    %c0_i32_1 = arith.constant 0 : i32
    return %c0_i32, %c0_i32_0 : i32, i32
  }
  func.func @transform_8(%arg0: i32, %arg1: i32) -> (i32, i32, i32) {
    %c0_i32 = arith.constant 0 : i32
    %c0_i32_0 = arith.constant 0 : i32
    return %arg0, %arg1, %c0_i32 : i32, i32, i32
  }
  func.func @transform_9(%arg0: i32, %arg1: i32) -> (i32, i32, i32) {
    %c0_i32 = arith.constant 0 : i32
    %c0_i32_0 = arith.constant 0 : i32
    return %arg0, %arg1, %c0_i32 : i32, i32, i32
  }
}

</mosaic_0001>

<bundles_post_ra>
// kernel: tpu_custom_call.1
= control target key start
LH: loop header
LB: loop body
LE: loop exit
PB: predicated region body
PF: predicated region fallthrough
CT: control target
= control target key end

     0   :  { %s1441_s0 = inlined_call_operand.hbm [shape: f32[2,8,32], index: 0, kind: input, shape index: {}]   ;;  %s1442_s1 = inlined_call_operand.hbm [shape: f32[32,32], index: 1, kind: input, shape index: {}]   ;;  %s1443_s2 = inlined_call_operand.vmem [shape: f32[1,32], index: 2, kind: input, shape index: {}]   ;;  %s1444_s3 = inlined_call_operand.hbm [shape: f32[32,32], index: 3, kind: input, shape index: {}]   ;;  %s1445_s4 = inlined_call_operand.vmem [shape: f32[1,32], index: 4, kind: input, shape index: {}]   ;;  %s1446_s5 = inlined_call_operand.hbm [shape: f32[32,32], index: 5, kind: input, shape index: {}]   ;;  %s1447_s6 = inlined_call_operand.hbm [shape: f32[32,32], index: 6, kind: input, shape index: {}]   ;;  %s1448_s7 = inlined_call_operand.vmem [shape: f32[1,32], index: 7, kind: input, shape index: {}]   ;;  %s1449_s8 = inlined_call_operand.hbm [shape: f32[2,8,32], index: 8, kind: output, shape index: {0}]   ;;  %s1450_s9 = inlined_call_operand.hbm [shape: f32[2,8,32], index: 9, kind: output, shape index: {1}]  }
   0x1   :  { %1452 = sst [smem:[#allocation19_spill]] %s1442_s1 }
   0x2   :  { %1453 = sst [smem:[#allocation20_spill]] %s1444_s3 }
   0x3   :  { %1454 = sst [smem:[#allocation21_spill]] %s1446_s5 }
   0x4   :  { %1455 = sst [smem:[#allocation22_spill]] %s1447_s6 }
   0x5   :  { %15 = vsyncpa [#allocation3], 0 }
   0x6   :  { %17 = vsyncpa [#allocation3 + $0x1], 0 }
   0x7   :  { %18 = vsyncpa [#allocation6], 0 }
   0x8   :  { %19 = vsyncpa [#allocation9], 0 }
   0x9   :  { %20 = vsyncpa [#allocation4], 0 }
   0xa   :  { %22 = vsyncpa [#allocation4 + $0x1], 0 }
   0xb   :  { %23 = vsyncpa [#allocation13], 0 }
   0xc   :  { %25 = vsyncpa [#allocation13 + $0x1], 0  ;;  %s1229_s30 = smov 0   ;;  %s1231_s10 = smov 0  }
   0xd   :  { %s1233_s11 = smov 0   ;;  %s1235_s12 = smov 0  }
   0xe   :  { %s1237_s13 = smov 0   ;;  %s1239_s14 = smov 0  }
   0xf LB: > { %s1451_s15 = sadd.s32 4294967295, %s1171_s14   ;;  %p760_p0 = scmp.ge.s32.totalorder %s1171_s14, 1  ;;  %s1171_s14 = sphi %s1239_s14, %s31_s14   ;;  %s1167_s13 = sphi %s1237_s13, %s1471_s13   ;;  %s1163_s12 = sphi %s1235_s12, %s1470_s12   ;;  %s1159_s11 = sphi %s1233_s11, %s1469_s11   ;;  %s1155_s10 = sphi %s1231_s10, %s1468_s10   ;;  %s1151_s30 = sphi %s1229_s30, %s1467_s30  }
  0x10   : > { %p1263_p1 = scmp.eq.s32.totalorder %s1451_s15, 0  ;;  %p279_p2 = scmp.lt.s32.totalorder %s1171_s14, 3 }
  0x11   : > { %s1457_s1 = sld [smem:[#allocation19_spill]]  ;;  %s1173_s21 = smov [#allocation5]  }
  0x12   : > { %p1271_p3 = pnand %p760_p0, %p279_p2  ;;  %s292_s22 = sshll.u32 %s1173_s21, 4  ;;  %s293_s22 = int_to_ptr.vmem [resolvable:$true] %s292_s22 }
  0x13   : > { %p765_p6 = scmp.ge.s32.totalorder %s1171_s14, 2  ;;  %s1460_s5 = sld [smem:[#allocation21_spill]] }
  0x14   : > { %p808_p4 = pneg %p1271_p3  ;;  %s1174_s27 = smov 128  }
  0x15   : > { %s1175_s28 = smov 8   ;;  %s1176_s29 = smov [#allocation8]  }
  0x16   : > { %p1279_p5 = pnand %p808_p4, %p1263_p1  ;;  %s326_s17 = sshll.u32 %s1176_s29, 4  ;;  %s327_s17 = int_to_ptr.vmem [resolvable:$true] %s326_s17 }
  0x17   : > { %s290_s19 = sshll.u32 %s1457_s1, 4  ;;  %s1461_s3 = sld [smem:[#allocation20_spill]]  ;;  %s291_s19 = int_to_ptr.hbm [resolvable:$true] %s290_s19 }
  0x18   : > { %811 = dma.hbm_to_vmem [thread:$0]  (!%p1279_p5), %s291_s19, 512, %s293_s22, [#allocation6], %s1174_s27, %s1174_s27, %s1175_s28  }
  0x19   : > { %s324_s26 = sshll.u32 %s1460_s5, 4  ;;  %s1462_s6 = sld [smem:[#allocation22_spill]]  ;;  %s325_s26 = int_to_ptr.hbm [resolvable:$true] %s324_s26 }
  0x1a   : > { %817 = dma.hbm_to_vmem [thread:$0]  (!%p1279_p5), %s325_s26, 512, %s327_s17, [#allocation9], %s1174_s27, %s1174_s27, %s1175_s28  }
  0x1b   : > { %s1177_s22 = smov [#allocation7]   ;;  %s1178_s18 = smov [#allocation10]  }
  0x1c   : > { %s309_s29 = sshll.u32 %s1177_s22, 4  ;;  %s340_s21 = sshll.u32 %s1178_s18, 4  ;;  %s310_s29 = int_to_ptr.vmem [resolvable:$true] %s309_s29  ;;  %s341_s21 = int_to_ptr.vmem [resolvable:$true] %s340_s21 }
  0x1d   : > { %s307_s15 = sshll.u32 %s1461_s3, 4  ;;  %s43_s26 = sadd.s32 1, %s1167_s13  ;;  %s308_s15 = int_to_ptr.hbm [resolvable:$true] %s307_s15 }
  0x1e   : > { %814 = dma.hbm_to_vmem [thread:$0]  (!%p1279_p5), %s308_s15, 512, %s310_s29, [#allocation6], %s1174_s27, %s1174_s27, %s1175_s28  }
  0x1f   : > { %s338_s19 = sshll.u32 %s1462_s6, 4  ;;  %s759_s17 = sadd.s32 4294967294, %s1171_s14   ;;  %s339_s19 = int_to_ptr.hbm [resolvable:$true] %s338_s19 }
  0x20   : > { %820 = dma.hbm_to_vmem [thread:$0]  (!%p1279_p5), %s339_s19, 512, %s341_s21, [#allocation9], %s1174_s27, %s1174_s27, %s1175_s28  }
  0x21   : > { %p45_p7 = scmp.ge.s32.totalorder %s43_s26, 2  ;;  %s52_s24 = sadd.s32 1, %s1159_s11 }
  0x22   : > { %p59_p8 = scmp.ne.s32.totalorder %s1159_s11, %s1155_s10  ;;  %p60_p9 = scmp.eq.s32.totalorder %s1171_s14, 0 }
  0x23   : > { %s1473_s26 = smov (%p45_p7, %s43_s26), 0  ;;  %p65_p10 = scmp.ne.s32.totalorder %s1155_s10, %s1151_s30 }
  0x24   : > { %s47_s15 = ssub.s32 %s1167_s13, %s1473_s26  ;;  %s1463_s25 = sadd.s32 4294967295, %s1171_s14  }
  0x25   : > { %p238_p11 = scmp.eq.s32.totalorder %s1463_s25, 1  ;;  %p50_p12 = scmp.eq.s32.totalorder %s47_s15, 0 }
  0x26   : > { %p1317_p13 = por %p1263_p1, %p65_p10  ;;  %p244_p2 = scmp.eq.s32.totalorder %s759_s17, 1 }
  0x27   : > { %p1321_p0 = por %p238_p11, %p59_p8  ;;  %p61_p4 = por %p60_p9, %p59_p8 }
  0x28   : > { %s1326_s28 = scalar_select %p50_p12, %s1159_s11, %s52_s24  }
  0x29   : > { %p1328_p5 = por %p244_p2, %p65_p10  ;;  %s357_s22 = sand.u32 1, %s1159_s11  }
  0x2a   : > { %s767_s29 = sshll.u32 %s1167_s13, 3  ;;  %p836_p7 = scmp.lt.s32.totalorder %s1171_s14, 2 }
  0x2b   : > { %s766_s18 = sshll.u32 %s357_s22, 3  ;;  %s366_s25 = scalar_lea.hbm %s1441_s0, %s767_s29 }
  0x2c   : > { %s368_s1 = sshll.u32 %s366_s25, 4  ;;  %s361_s3 = scalar_lea.vmem [#allocation2], %s766_s18  ;;  %s369_s1 = int_to_ptr.hbm [resolvable:$true] %s368_s1 }
  0x2d   : > { %s370_s5 = sshll.u32 %s361_s3, 4  ;;  %p822_p11 = pnand %p836_p7, %p61_p4  ;;  %s371_s5 = int_to_ptr.vmem [resolvable:$true] %s370_s5 }
  0x2e   : > { %s358_s17 = scalar_lea.sflag [#allocation3], %s357_s22  ;;  %379 = sbr.rel (%p1271_p3) target bundleno = 342 (0x156), region = 52 }
  0x2f   : > { %824 = dma.hbm_to_vmem [thread:$0]  (!%p822_p11), %s369_s1, 128, %s371_s5, %s358_s17  }
  0x30   : > { %s1341_s24 = sand.u32 (!%p1271_p3), 1, %s1155_s10  }
  0x31   : > { %s1344_s6 = sshll.u32 (!%p1271_p3), %s1341_s24, 3  ;;  %s382_s29 = scalar_lea.sflag (!%p1271_p3), [#allocation3], %s1341_s24 }
  0x32   : > { %s385_s18 = scalar_lea.vmem (!%p1271_p3), [#allocation2], %s1344_s6 }
  0x33   : > { %1130 = dma.done.wait (%p1317_p13), %s382_s29, 128  }
  0x34   : > { %1132 = vsyncadd (%p1317_p13), %s382_s29, 4294967168 }
  0x35   : > { %1134 = dma.done.wait (%p1263_p1), [#allocation6], 1024  }
  0x36   : > { %1136 = vsyncadd (%p1263_p1), [#allocation6], 4294966272 }
  0x37   : > { %1138 = dma.done.wait (%p1263_p1), [#allocation9], 1024  }
  0x38   : > { %1140 = vsyncadd (%p1263_p1), [#allocation9], 4294966272  ;;  %v483_v0 = vld [vmem:[#allocation7 + $0x18] sm:$0xff]  ;;  %v482_v2 = vld [vmem:[#allocation7 + $0x10] sm:$0xff]  ;;  %vm455_vm0 = vcmask 261120   ;;  %s782_s20 = sshll.u32 %s1163_s12, 3 }
  0x39   : > { %v450_v1 = vld [vmem:[#allocation5 + $0x18] sm:$0xff]  ;;  %500 = vmatpush.msra.mxu1 %v483_v0  ;;  %v449_v3 = vld [vmem:[#allocation5 + $0x10] sm:$0xff]  ;;  %v481_v4 = vld [vmem:[#allocation7 + $0x8] sm:$0xff]  ;;  %s586_s21 = scalar_lea.hbm %s1449_s8, %s782_s20  ;;  %s601_s17 = scalar_lea.hbm %s1450_s9, %s782_s20 }
  0x3a   : > { %471 = vmatpush.msra.mxu0 %v450_v1  ;;  %v448_v5 = vld [vmem:[#allocation5 + $0x8] sm:$0xff]  ;;  %v480_v6 = vld [vmem:[#allocation7] sm:$0xff]  ;;  %v539_v7 = vld [vmem:[#allocation10 + $0x18] sm:$0xff]  ;;  %s438_s29 = scalar_lea.vmem [#allocation11], %s1344_s6  ;;  %s590_s1 = sshll.u32 %s586_s21, 4  ;;  %s591_s1 = int_to_ptr.hbm [resolvable:$true] %s590_s1 }
  0x3b   : > { %501 = vmatpush.msra.mxu1 %v482_v2  ;;  %v447_v8 = vld [vmem:[#allocation5] sm:$0xff]  ;;  %559 = vmatpush.msra.mxu3 %v539_v7  ;;  %v446_v9 = vld [vmem:[%s385_s18] sm:$0xff]  ;;  %v537_v13 = vld [vmem:[#allocation10 + $0x8] sm:$0xff]  ;;  %s1378_s18 = sshll.u32 %s438_s29, 4  ;;  %s445_s16 = scalar_lea.vmem [#allocation12], %s1344_s6  ;;  %s589_s18 = int_to_ptr.vmem [resolvable:$true] %s1378_s18 }
  0x3c   : > { %472 = vmatpush.msra.mxu0 %v449_v3  ;;  %v512_v10 = vld [vmem:[#allocation8 + $0x18] sm:$0xff]  ;;  %v538_v11 = vld [vmem:[#allocation10 + $0x10] sm:$0xff]  ;;  %v510_v14 = vld [vmem:[#allocation8 + $0x8] sm:$0xff]  ;;  %s1384_s12 = sshll.u32 %s445_s16, 4  ;;  %s605_s23 = sshll.u32 %s601_s17, 4  ;;  %s604_s12 = int_to_ptr.vmem [resolvable:$true] %s1384_s12  ;;  %s1389_s23 = int_to_ptr.hbm [resolvable:$true] %s605_s23 }
  0x3d   : > { %502 = vmatpush.msra.mxu1 %v481_v4  ;;  %528 = vmatpush.msra.mxu2 %v512_v10  ;;  %v511_v12 = vld [vmem:[#allocation8 + $0x10] sm:$0xff]  ;;  %v536_v15 = vld [vmem:[#allocation10] sm:$0xff]  ;;  %s570_s20 = scalar_lea.sflag [#allocation4], %s1341_s24  ;;  %s1063_s22 = sshra.s32 %s591_s1, 4  ;;  %s1064_s22 = int_to_ptr.hbm [resolvable:$true] %s1063_s22 }
  0x3e   : > { %473 = vmatpush.msra.mxu0 %v448_v5  ;;  %560 = vmatpush.msra.mxu3 %v538_v11  ;;  %v509_v16 = vld [vmem:[#allocation8] sm:$0xff]  ;;  %v896_v17 = vld [vmem:[%s1445_s4] ss:$0 sm:$0xff]  ;;  %s1065_s21 = scalar_lea.hbm %s1064_s22, 8  ;;  %s1069_s25 = scalar_lea.hbm %s1449_s8, 16 }
  0x3f   : > { %503 = vmatpush.msra.mxu1 %v480_v6  ;;  %529 = vmatpush.msra.mxu2 %v511_v12  ;;  %v897_v18 = vld [vmem:[%s1443_s2] ss:$0 sm:$0xff]  ;;  %p1066_p1 = scmp.ne.s32.totalorder %s1064_s22, %s1065_s21  ;;  %p1070_p9 = scmp.lt.s32.totalorder %s1064_s22, %s1449_s8 }
  0x40   : > { %474 = vmatpush.msra.mxu0 %v447_v8  ;;  %777 = vmatmul.msk.f32.vlgmr.msra.gmra.mxu1 %vm455_vm0, %v446_v9  ;;  %v898_v25 = vld [vmem:[%s1448_s7] ss:$0 sm:$0xff]  ;;  %p1071_p10 = scmp.lt.s32.totalorder %s1069_s25, %s1065_s21 }
  0x41   : > { %776 = vmatmul.msk.f32.vlgmr.msra.gmra.mxu0 %vm455_vm0, %v446_v9  ;;  %561 = vmatpush.msra.mxu3 %v537_v13  ;;  %p1067_p3 = pnand %p1066_p1, %p1321_p0 }
  0x42   : > { %530 = vmatpush.msra.mxu2 %v510_v14  ;;  %p1072_p12 = por %p1071_p10, %p1070_p9 }
  0x43   : > { %562 = vmatpush.msra.mxu3 %v536_v15  ;;  %p1068_p8 = pneg %p1067_p3 }
  0x44   : > { %531 = vmatpush.msra.mxu2 %v509_v16 }
  0x45   : > { %p1073_p13 = pnand %p1072_p12, %p1068_p8 }
  0xbd   : > { %v505_v19 = vpop.f32.mrf.mxu1 }
  0xbe   : > { %v476_v20 = vpop.f32.mrf.mxu0  ;;  %v506_v21 = vadd.f32 %v896_v17, %v505_v19 }
  0xbf   : > { %v477_v22 = vadd.f32 %v897_v18, %v476_v20 }
  0xc0   : > { %v508_v23 = vmax.f32 %v506_v21, 0.0 }
  0xc1   : > { %v479_v24 = vmax.f32 %v477_v22, 0.0 }
  0xc2   : > { %779 = vmatmul.msk.f32.vlgmr.msra.gmra.mxu3 %vm455_vm0, %v508_v23 }
  0xc3   : > { %778 = vmatmul.msk.f32.vlgmr.msra.gmra.mxu2 %vm455_vm0, %v479_v24 }
 0x145   : > { %v564_v26 = vpop.f32.mrf.mxu3 }
 0x146   : > { %v533_v27 = vpop.f32.mrf.mxu2  ;;  %v565_v28 = vadd.f32 %v898_v25, %v564_v26 }
 0x147   : > { %567 = vst.msk [vmem:[%s438_s29] sm:$0xff] %vm455_vm0, %v533_v27 }
 0x148   : > { %1076 = shalt.err (!%p1073_p13)
}
 0x149   : > { %804 = dma.vmem_to_hbm [thread:$0]  (%p1321_p0), %s589_s18, 128, %s591_s1, %s570_s20   ;;  %568 = vst.msk [vmem:[%s445_s16] sm:$0xff] %vm455_vm0, %v565_v28 }
 0x14a   : > { %s575_s29 = scalar_lea.sflag [#allocation13], %s1341_s24  ;;  %s1091_s5 = sshra.s32 %s1389_s23, 4  ;;  %s1092_s5 = int_to_ptr.hbm [resolvable:$true] %s1091_s5 }
 0x14b   : > { %s1093_s6 = scalar_lea.hbm %s1092_s5, 8  ;;  %s1097_s15 = scalar_lea.hbm %s1450_s9, 16 }
 0x14c   : > { %p1094_p2 = scmp.ne.s32.totalorder %s1092_s5, %s1093_s6  ;;  %p1098_p11 = scmp.lt.s32.totalorder %s1092_s5, %s1450_s9 }
 0x14d   : > { %p1099_p1 = scmp.lt.s32.totalorder %s1097_s15, %s1093_s6 }
 0x14e   : > { %p1095_p4 = pnand %p1094_p2, %p1321_p0 }
 0x14f   : > { %p1100_p3 = por %p1099_p1, %p1098_p11 }
 0x150   : > { %p1096_p7 = pneg %p1095_p4 }
 0x152   : > { %p1101_p8 = pnand %p1100_p3, %p1096_p7 }
 0x154   : > { %1104 = shalt.err (!%p1101_p8)
}
 0x155   : > { %805 = dma.vmem_to_hbm [thread:$0]  (%p1321_p0), %s604_s12, 128, %s1389_s23, %s575_s29  }
 0x156 PF: > { %s617_s24 = sand.u32 1, %s1151_s30   ;;  %p826_p9 = pnand %p765_p6, %p1328_p5 }
 0x157   : > { %s618_s18 = scalar_lea.sflag [#allocation4], %s617_s24 }
 0x158   : > { %p827_p10 = pneg %p826_p9 }
 0x15a   : > { %1142 = dma.done.wait (%p827_p10), %s618_s18, 128  }
 0x15b   : > { %1144 = vsyncadd (%p827_p10), %s618_s18, 4294967168  ;;  %s628_s1 = scalar_lea.sflag [#allocation13], %s617_s24 }
 0x15c   : > { %1146 = dma.done.wait (%p827_p10), %s628_s1, 128  }
 0x15d   : > { %1148 = vsyncadd (%p827_p10), %s628_s1, 4294967168  ;;  %s31_s14 = sadd.s32 1, %s1171_s14   ;;  %s1467_s30 = smov %s1155_s10 }
 0x15e   : > { %p28_p12 = scmp.ge.s32.totalorder %s31_s14, 4   ;;  %s1468_s10 = smov %s1159_s11 }
 0x15f   : > { %s1469_s11 = smov %s1326_s28  ;;  %s1470_s12 = smov %s1167_s13 }
 0x160   : > { %s1471_s13 = smov %s1473_s26  ;;  %30 = sbr.rel (!%p28_p12) target bundleno = 15 (0xf), region = 130 }
 0x165   :  { %634 = vsyncpa [#allocation3], 1 }
 0x166   :  { %636 = vsyncpa [#allocation3 + $0x1], 1 }
 0x167   :  { %637 = vsyncpa [#allocation6], 1 }
 0x168   :  { %638 = vsyncpa [#allocation9], 1 }
 0x169   :  { %639 = vsyncpa [#allocation4], 1 }
 0x16a   :  { %641 = vsyncpa [#allocation4 + $0x1], 1 }
 0x16b   :  { %642 = vsyncpa [#allocation13], 1 }
 0x16c   :  { %644 = vsyncpa [#allocation13 + $0x1], 1 }

</bundles_post_ra>
